<compile_context>
chip_gen: v5e
topology: v5e:2x2
jax: 0.10.0
libtpu: 0.0.40
codegen_flags: <defaults>
</compile_context>

<pallas_src>
import jax
import jax.numpy as jnp
from jax import lax
from jax.experimental import pallas as pl
from jax.experimental.pallas import tpu as pltpu

EPS = 1e-5                      # nn.BatchNorm2d default eps
_VMEM_LIMIT = 32 * 1024 * 1024  # fits scoped VMEM on v5e/v6e/v7x


def _round_up(x, m):
    return (x + m - 1) // m * m


def _extract_taps(x_nhwc, kh, kw, stride, padding, pad_value=0.0):
    """KH*KW shifted/strided taps of a spatially padded NHWC tensor, each (N,Ho,Wo,C)."""
    n, h, w, c = x_nhwc.shape
    ho = (h + 2 * padding - kh) // stride + 1
    wo = (w + 2 * padding - kw) // stride + 1
    xp = jnp.pad(x_nhwc, ((0, 0), (padding, padding), (padding, padding), (0, 0)),
                 constant_values=pad_value)
    taps = []
    for dy in range(kh):
        for dx in range(kw):
            taps.append(lax.slice(
                xp,
                (0, dy, dx, 0),
                (n, dy + stride * (ho - 1) + 1, dx + stride * (wo - 1) + 1, c),
                (1, stride, stride, 1)))
    return taps, ho, wo


# ---------------------------------------------------------------------------
# Pallas kernels
# ---------------------------------------------------------------------------

def _conv_stats_kernel(p_ref, w_ref, y_ref, sum_ref, sq_ref):
    """Phase 1: conv tile as bf16 MXU matmul + per-channel sum / sumsq accumulation."""
    i = pl.program_id(0)
    y = jnp.dot(p_ref[...], w_ref[...], preferred_element_type=jnp.float32)
    y_ref[...] = y

    @pl.when(i == 0)
    def _():
        sum_ref[...] = jnp.zeros_like(sum_ref)
        sq_ref[...] = jnp.zeros_like(sq_ref)

    # Padded (zero) rows contribute 0 to both sums, so dividing by the real M is exact.
    sum_ref[...] += jnp.sum(y, axis=0, keepdims=True)
    sq_ref[...] += jnp.sum(y * y, axis=0, keepdims=True)


def _bn_relu_kernel(y_ref, scale_ref, shift_ref, o_ref):
    """Phase 2: BN folded into one FMA + ReLU."""
    o_ref[...] = jnp.maximum(y_ref[...] * scale_ref[...] + shift_ref[...], 0.0)


def _maxpool_kernel(t_ref, o_ref):
    """Elementwise max over the KH*KW tap axis."""
    r = t_ref[0]
    for k in range(1, t_ref.shape[0]):
        r = jnp.maximum(r, t_ref[k])
    o_ref[...] = r


# ---------------------------------------------------------------------------
# Wrappers
# ---------------------------------------------------------------------------

def basic_block(x_nhwc, w_oihw, gamma, beta, *, stride, padding, tile_m=256):
    """Conv2d(no bias) -> BatchNorm2d(batch stats) -> ReLU, NHWC in / NHWC out."""
    n, h, w_in, cin = x_nhwc.shape
    cout, cin_w, kh, kw = w_oihw.shape
    assert cin_w == cin

    taps, ho, wo = _extract_taps(x_nhwc, kh, kw, stride, padding, 0.0)
    m = n * ho * wo
    k = kh * kw * cin
    patches = jnp.concatenate(taps, axis=-1).reshape(m, k)

    # Lane-dense padding of both matmul dims; M padded to the tile size with zero rows.
    k_pad = _round_up(k, 128)
    c_pad = _round_up(cout, 128)
    tm = min(tile_m, _round_up(m, 8))
    m_pad = _round_up(m, tm)
    grid = (m_pad // tm,)

    patches_p = jnp.zeros((m_pad, k_pad), jnp.bfloat16).at[:m, :k].set(
        patches.astype(jnp.bfloat16))
    w_mat = jnp.transpose(w_oihw, (2, 3, 1, 0)).reshape(k, cout)       # (kh,kw,cin) x cout
    w_p = jnp.zeros((k_pad, c_pad), jnp.bfloat16).at[:k, :cout].set(
        w_mat.astype(jnp.bfloat16))

    # Phase 1: tiled conv + global BN statistics (reduction axis -> "arbitrary").
    y, s1, s2 = pl.pallas_call(
        _conv_stats_kernel,
        out_shape=(
            jax.ShapeDtypeStruct((m_pad, c_pad), jnp.float32),
            jax.ShapeDtypeStruct((1, c_pad), jnp.float32),
            jax.ShapeDtypeStruct((1, c_pad), jnp.float32),
        ),
        grid=grid,
        in_specs=[
            pl.BlockSpec((tm, k_pad), lambda i: (i, 0)),
            pl.BlockSpec((k_pad, c_pad), lambda i: (0, 0)),
        ],
        out_specs=(
            pl.BlockSpec((tm, c_pad), lambda i: (i, 0)),
            pl.BlockSpec((1, c_pad), lambda i: (0, 0)),   # resident accumulator
            pl.BlockSpec((1, c_pad), lambda i: (0, 0)),   # resident accumulator
        ),
        compiler_params=pltpu.CompilerParams(
            dimension_semantics=("arbitrary",),
            vmem_limit_bytes=_VMEM_LIMIT),
    )(patches_p, w_p)

    # Fold BN into per-channel scale/shift (tiny, f32).
    inv_m = jnp.float32(1.0 / m)
    mean = s1 * inv_m
    var = jnp.maximum(s2 * inv_m - mean * mean, 0.0)   # biased variance, clamp fp noise
    g = jnp.zeros((1, c_pad), jnp.float32).at[0, :cout].set(gamma)
    b = jnp.zeros((1, c_pad), jnp.float32).at[0, :cout].set(beta)
    scale = g * lax.rsqrt(var + EPS)
    shift = b - mean * scale

    # Phase 2: normalize + affine + ReLU (fully parallel over M tiles).
    out2d = pl.pallas_call(
        _bn_relu_kernel,
        out_shape=jax.ShapeDtypeStruct((m_pad, c_pad), jnp.float32),
        grid=grid,
        in_specs=[
            pl.BlockSpec((tm, c_pad), lambda i: (i, 0)),
            pl.BlockSpec((1, c_pad), lambda i: (0, 0)),
            pl.BlockSpec((1, c_pad), lambda i: (0, 0)),
        ],
        out_specs=pl.BlockSpec((tm, c_pad), lambda i: (i, 0)),
        compiler_params=pltpu.CompilerParams(
            dimension_semantics=("parallel",),
            vmem_limit_bytes=_VMEM_LIMIT),
    )(y, scale, shift)

    return out2d[:m, :cout].reshape(n, ho, wo, cout)


def max_pool_3x3_s2_p1(x_nhwc, *, tile_m=256):
    """MaxPool2d(kernel_size=3, stride=2, padding=1), NHWC in / NHWC out."""
    n, h, w, c = x_nhwc.shape
    taps, ho, wo = _extract_taps(x_nhwc, 3, 3, 2, 1, pad_value=-jnp.inf)
    m = n * ho * wo
    t = jnp.stack([tp.reshape(m, c) for tp in taps], axis=0)   # (9, M, C)
    tm = min(tile_m, _round_up(m, 8))
    m_pad = _round_up(m, tm)
    if m_pad != m:
        t = jnp.pad(t, ((0, 0), (0, m_pad - m), (0, 0)))

    out = pl.pallas_call(
        _maxpool_kernel,
        out_shape=jax.ShapeDtypeStruct((m_pad, c), jnp.float32),
        grid=(m_pad // tm,),
        in_specs=[pl.BlockSpec((9, tm, c), lambda i: (0, i, 0))],
        out_specs=pl.BlockSpec((tm, c), lambda i: (i, 0)),
        compiler_params=pltpu.CompilerParams(
            dimension_semantics=("parallel",),
            vmem_limit_bytes=_VMEM_LIMIT),
    )(t)
    return out[:m].reshape(n, ho, wo, c)


def stem_block(x_nchw, params):
    """StemBlock.forward. Input/output NCHW (like PyTorch); NHWC internally."""
    x = jnp.transpose(x_nchw, (0, 2, 3, 1))                # NCHW -> NHWC (once)
    w, g, b = params["conv"]
    x1 = basic_block(x, w, g, b, stride=2, padding=1)
    w, g, b = params["left1"]
    xl = basic_block(x1, w, g, b, stride=1, padding=0)
    w, g, b = params["left2"]
    xl = basic_block(xl, w, g, b, stride=2, padding=1)
    xr = max_pool_3x3_s2_p1(x1)
    xc = jnp.concatenate([xl, xr], axis=-1)                # channel concat in NHWC
    w, g, b = params["fuse"]
    y = basic_block(xc, w, g, b, stride=1, padding=1)
    return jnp.transpose(y, (0, 3, 1, 2))                  # NHWC -> NCHW (once)


# ---------------------------------------------------------------------------
# Pure-JAX f32 reference (correctness check only)
# ---------------------------------------------------------------------------

def _ref_basic_block(x, w, g, b, stride, padding):
    y = lax.conv_general_dilated(
        x, w, (stride, stride), ((padding, padding), (padding, padding)),
        dimension_numbers=("NCHW", "OIHW", "NCHW"))
    mean = jnp.mean(y, axis=(0, 2, 3), keepdims=True)
    var = jnp.mean((y - mean) ** 2, axis=(0, 2, 3), keepdims=True)
    out = (y - mean) * lax.rsqrt(var + EPS) * g.reshape(1, -1, 1, 1) + b.reshape(1, -1, 1, 1)
    return jnp.maximum(out, 0.0)


def reference_stem_block(x, params):
    x1 = _ref_basic_block(x, *params["conv"], 2, 1)
    xl = _ref_basic_block(x1, *params["left1"], 1, 0)
    xl = _ref_basic_block(xl, *params["left2"], 2, 1)
    xr = lax.reduce_window(x1, -jnp.inf, lax.max, (1, 1, 3, 3), (1, 1, 2, 2),
                           ((0, 0), (0, 0), (1, 1), (1, 1)))
    xc = jnp.concatenate([xl, xr], axis=1)
    return _ref_basic_block(xc, *params["fuse"], 1, 1)


if __name__ == "__main__":
    key = jax.random.PRNGKey(0)
    keys = jax.random.split(key, 13)

    N, Cin, H, W = 2, 3, 32, 32
    x = jax.random.normal(keys[0], (N, Cin, H, W), dtype=jnp.float32)

    def make_params(kidx, cin, cout, ksz):
        w = jax.random.normal(keys[kidx], (cout, cin, ksz, ksz), jnp.float32)
        w = w * (1.0 / (ksz * ksz * cin)) ** 0.5
        g = 1.0 + 0.1 * jax.random.normal(keys[kidx + 1], (cout,), jnp.float32)
        b = 0.1 * jax.random.normal(keys[kidx + 2], (cout,), jnp.float32)
        return (w, g, b)

    params = {
        "conv":  make_params(1, 3, 16, 3),    # BasicBlock(3, 16, k3, s2)
        "left1": make_params(4, 16, 8, 1),    # BasicBlock(16, 8, k1, s1, p0)
        "left2": make_params(7, 8, 16, 3),    # BasicBlock(8, 16, k3, s2)
        "fuse":  make_params(10, 32, 16, 3),  # BasicBlock(32, 16, k3, s1)
    }

    out = jax.block_until_ready(stem_block(x, params))
    ref = jax.block_until_ready(reference_stem_block(x, params))

    assert out.shape == ref.shape == (N, 16, H // 4, W // 4)
    # Loose tolerance: kernel uses bf16 MXU operands; reference is pure f32.
    assert jnp.allclose(out, ref, rtol=1e-1, atol=1e-1), (
        "mismatch vs reference, max abs err = "
        f"{float(jnp.max(jnp.abs(out - ref)))}")

    print("KERNEL_OK")
</pallas_src>

<mosaic_0001>
module attributes {stable_mosaic.version = 11 : i64} {
  func.func @_conv_stats_kernel(%arg0: i32, %arg1: memref<256x128xbf16, #tpu.memory_space<vmem>>, %arg2: memref<128x128xbf16, #tpu.memory_space<vmem>>, %arg3: memref<256x128xf32, #tpu.memory_space<vmem>>, %arg4: memref<1x128xf32, #tpu.memory_space<vmem>>, %arg5: memref<1x128xf32, #tpu.memory_space<vmem>>) attributes {dimension_semantics = [#tpu.dimension_semantics<arbitrary>], iteration_bounds = array<i64: 2>, scalar_prefetch = 0 : i64, scratch_operands = 0 : i64, tpu.core_type = #tpu.core_type<tc>, window_params = [{transform_indices = @transform_0, window_bounds = array<i64: 256, 128>}, {pipeline_mode = #tpu.pipeline_mode<synchronous>, transform_indices = @transform_1, window_bounds = array<i64: 128, 128>}, {transform_indices = @transform_2, window_bounds = array<i64: 256, 128>}, {pipeline_mode = #tpu.pipeline_mode<synchronous>, transform_indices = @transform_3, window_bounds = array<i64: 1, 128>}, {pipeline_mode = #tpu.pipeline_mode<synchronous>, transform_indices = @transform_4, window_bounds = array<i64: 1, 128>}]} {
    %c0 = arith.constant 0 : index
    %c0_0 = arith.constant 0 : index
    %0 = vector.load %arg1[%c0, %c0_0] : memref<256x128xbf16, #tpu.memory_space<vmem>>, vector<256x128xbf16>
    %c0_1 = arith.constant 0 : index
    %c0_2 = arith.constant 0 : index
    %1 = vector.load %arg2[%c0_1, %c0_2] : memref<128x128xbf16, #tpu.memory_space<vmem>>, vector<128x128xbf16>
    %cst = arith.constant dense<0.000000e+00> : vector<256x128xf32>
    %2 = tpu.matmul %0, %1, %cst {dimension_numbers = #tpu.dot_dimension_numbers<[1], [0], [0], [1], [0, 0, 1, 1], [], []>} : vector<256x128xbf16>, vector<128x128xbf16>, vector<256x128xf32> -> vector<256x128xf32>
    %c0_3 = arith.constant 0 : index
    %c0_4 = arith.constant 0 : index
    %3 = vector.load %arg3[%c0_3, %c0_4] : memref<256x128xf32, #tpu.memory_space<vmem>>, vector<256x128xf32>
    tpu.vector_store %arg3[%c0_3, %c0_4], %2 {strides = array<i32>} : memref<256x128xf32, #tpu.memory_space<vmem>>, vector<256x128xf32>,
    %c0_i32 = arith.constant 0 : i32
    %4 = arith.cmpi eq, %arg0, %c0_i32 : i32
    %5 = arith.extui %4 : i1 to i32
    %c0_i32_5 = arith.constant 0 : i32
    %6 = arith.cmpi ne, %5, %c0_i32_5 : i32
    scf.if %6 {
      %cst_16 = arith.constant 0.000000e+00 : f32
      %18 = vector.broadcast %cst_16 : f32 to vector<1x128xf32>
      %c0_17 = arith.constant 0 : index
      %c0_18 = arith.constant 0 : index
      %19 = vector.load %arg4[%c0_17, %c0_18] : memref<1x128xf32, #tpu.memory_space<vmem>>, vector<1x128xf32>
      tpu.vector_store %arg4[%c0_17, %c0_18], %18 {strides = array<i32>} : memref<1x128xf32, #tpu.memory_space<vmem>>, vector<1x128xf32>,
      %cst_19 = arith.constant 0.000000e+00 : f32
      %20 = vector.broadcast %cst_19 : f32 to vector<1x128xf32>
      %c0_20 = arith.constant 0 : index
      %c0_21 = arith.constant 0 : index
      %21 = vector.load %arg5[%c0_20, %c0_21] : memref<1x128xf32, #tpu.memory_space<vmem>>, vector<1x128xf32>
      tpu.vector_store %arg5[%c0_20, %c0_21], %20 {strides = array<i32>} : memref<1x128xf32, #tpu.memory_space<vmem>>, vector<1x128xf32>,
    } else {
    }
    %c0_6 = arith.constant 0 : index
    %c0_7 = arith.constant 0 : index
    %7 = vector.load %arg4[%c0_6, %c0_7] : memref<1x128xf32, #tpu.memory_space<vmem>>, vector<1x128xf32>
    %cst_8 = arith.constant dense<0.000000e+00> : vector<128xf32>
    %8 = vector.multi_reduction <add>, %2, %cst_8 [0] : vector<256x128xf32> to vector<128xf32>
    %9 = vector.shape_cast %8 : vector<128xf32> to vector<1x128xf32>
    %10 = arith.addf %7, %9 : vector<1x128xf32>
    %c0_9 = arith.constant 0 : index
    %c0_10 = arith.constant 0 : index
    %11 = vector.load %arg4[%c0_9, %c0_10] : memref<1x128xf32, #tpu.memory_space<vmem>>, vector<1x128xf32>
    tpu.vector_store %arg4[%c0_9, %c0_10], %10 {strides = array<i32>} : memref<1x128xf32, #tpu.memory_space<vmem>>, vector<1x128xf32>,
    %c0_11 = arith.constant 0 : index
    %c0_12 = arith.constant 0 : index
    %12 = vector.load %arg5[%c0_11, %c0_12] : memref<1x128xf32, #tpu.memory_space<vmem>>, vector<1x128xf32>
    %13 = arith.mulf %2, %2 : vector<256x128xf32>
    %cst_13 = arith.constant dense<0.000000e+00> : vector<128xf32>
    %14 = vector.multi_reduction <add>, %13, %cst_13 [0] : vector<256x128xf32> to vector<128xf32>
    %15 = vector.shape_cast %14 : vector<128xf32> to vector<1x128xf32>
    %16 = arith.addf %12, %15 : vector<1x128xf32>
    %c0_14 = arith.constant 0 : index
    %c0_15 = arith.constant 0 : index
    %17 = vector.load %arg5[%c0_14, %c0_15] : memref<1x128xf32, #tpu.memory_space<vmem>>, vector<1x128xf32>
    tpu.vector_store %arg5[%c0_14, %c0_15], %16 {strides = array<i32>} : memref<1x128xf32, #tpu.memory_space<vmem>>, vector<1x128xf32>,
    return
  }
  func.func @transform_0(%arg0: i32) -> (i32, i32) {
    %c0_i32 = arith.constant 0 : i32
    %c0_i32_0 = arith.constant 0 : i32
    return %arg0, %c0_i32 : i32, i32
  }
  func.func @transform_1(%arg0: i32) -> (i32, i32) {
    %c0_i32 = arith.constant 0 : i32
    %c0_i32_0 = arith.constant 0 : i32
    %c0_i32_1 = arith.constant 0 : i32
    return %c0_i32, %c0_i32_0 : i32, i32
  }
  func.func @transform_2(%arg0: i32) -> (i32, i32) {
    %c0_i32 = arith.constant 0 : i32
    %c0_i32_0 = arith.constant 0 : i32
    return %arg0, %c0_i32 : i32, i32
  }
  func.func @transform_3(%arg0: i32) -> (i32, i32) {
    %c0_i32 = arith.constant 0 : i32
    %c0_i32_0 = arith.constant 0 : i32
    %c0_i32_1 = arith.constant 0 : i32
    return %c0_i32, %c0_i32_0 : i32, i32
  }
  func.func @transform_4(%arg0: i32) -> (i32, i32) {
    %c0_i32 = arith.constant 0 : i32
    %c0_i32_0 = arith.constant 0 : i32
    %c0_i32_1 = arith.constant 0 : i32
    return %c0_i32, %c0_i32_0 : i32, i32
  }
}

</mosaic_0001>

<bundles_post_ra>
// kernel: tpu_custom_call.1
= control target key start
LH: loop header
LB: loop body
LE: loop exit
PB: predicated region body
PF: predicated region fallthrough
CT: control target
= control target key end

     0   :  { %10 = vsyncpa [#allocation3], 0  ;;  %s1655_s0 = inlined_call_operand.hbm [shape: bf16[512,128], index: 0, kind: input, shape index: {}]   ;;  %s1656_s1 = inlined_call_operand.hbm [shape: bf16[128,128], index: 1, kind: input, shape index: {}]   ;;  %s1657_s2 = inlined_call_operand.hbm [shape: f32[512,128], index: 2, kind: output, shape index: {0}]   ;;  %s1658_s3 = inlined_call_operand.hbm [shape: f32[1,128], index: 3, kind: output, shape index: {1}]   ;;  %s1659_s4 = inlined_call_operand.hbm [shape: f32[1,128], index: 4, kind: output, shape index: {2}]  }
   0x1   :  { %12 = vsyncpa [#allocation3 + $0x1], 0 }
   0x2   :  { %13 = vsyncpa [#allocation6], 0 }
   0x3   :  { %14 = vsyncpa [#allocation4], 0 }
   0x4   :  { %16 = vsyncpa [#allocation4 + $0x1], 0 }
   0x5   :  { %17 = vsyncpa [#allocation9], 0  ;;  %s1278_s15 = smov 0   ;;  %s1280_s16 = smov 0  }
   0x6   :  { %s1282_s17 = smov 0   ;;  %s1284_s18 = smov 0  }
   0x7 LB: > { %s1299_s19 = sadd.s32 4294967295, %s1243_s18   ;;  %s810_s20 = sadd.s32 4294967294, %s1243_s18   ;;  %s1243_s18 = sphi %s1284_s18, %s1675_s18   ;;  %s1239_s17 = sphi %s1282_s17, %s1674_s17   ;;  %s1235_s16 = sphi %s1280_s16, %s1673_s16   ;;  %s1231_s15 = sphi %s1278_s15, %s1672_s15  }
   0x8   : > { %p43_p0 = scmp.ne.s32.totalorder %s1235_s16, %s1231_s15  ;;  %p44_p1 = scmp.eq.s32.totalorder %s1299_s19, 0 }
   0x9   : > { %p1660_p2 = scmp.eq.s32.totalorder %s1299_s19, 1  ;;  %p94_p3 = scmp.eq.s32.totalorder %s810_s20, 1 }
   0xa   : > { %p1308_p4 = por %p44_p1, %p43_p0  ;;  %p811_p5 = scmp.ge.s32.totalorder %s1243_s18, 1 }
   0xb   : > { %p1313_p6 = por %p94_p3, %p43_p0  ;;  %p143_p7 = scmp.lt.s32.totalorder %s1243_s18, 3 }
   0xc   : > { %s154_s25 = sshll.u32 %s1656_s1, 4  ;;  %s1245_s27 = smov [#allocation5]   ;;  %s155_s25 = int_to_ptr.hbm [resolvable:$true] %s154_s25 }
   0xd   : > { %p1322_p9 = pnand %p811_p5, %p143_p7  ;;  %s156_s28 = sshll.u32 %s1245_s27, 4  ;;  %s157_s28 = int_to_ptr.vmem [resolvable:$true] %s156_s28 }
   0xe   : > { %s1332_s29 = sadd.s32 1, %s1243_s18   ;;  %s1246_s30 = smov 64  }
   0xf   : > { %p993_p10 = pneg %p1322_p9  ;;  %s1247_s5 = smov 4  }
  0x10   : > { %s27_s6 = ssub.s32 %s1243_s18, %s1332_s29  ;;  %s30_s7 = sadd.s32 1, %s1239_s17 }
  0x11   : > { %p994_p11 = pnand %p993_p10, %p44_p1  ;;  %p28_p13 = scmp.eq.s32.totalorder %s27_s6, 0 }
  0x12   : > { %p37_p0 = scmp.ne.s32.totalorder %s1239_s17, %s1235_s16  ;;  %p38_p3 = scmp.eq.s32.totalorder %s1243_s18, 0 }
  0x13   : > { %996 = dma.hbm_to_vmem [thread:$0]  (!%p994_p11), %s155_s25, 1024, %s157_s28, [#allocation6], %s1246_s30, %s1246_s30, %s1247_s5  }
  0x14   : > { %s1344_s8 = scalar_select %p28_p13, %s1239_s17, %s30_s7  }
  0x15   : > { %p1348_p5 = por %p1660_p2, %p37_p0  ;;  %p1006_p7 = scmp.lt.s32.totalorder %s1243_s18, 2 }
  0x16   : > { %s170_s10 = sand.u32 1, %s1239_s17   ;;  %s927_s11 = sshll.u32 %s1243_s18, 7 }
  0x17   : > { %p39_p10 = por %p38_p3, %p37_p0  ;;  %s814_s12 = sshll.u32 %s170_s10, 7 }
  0x18   : > { %s179_s20 = scalar_lea.hbm %s1655_s0, %s927_s11  ;;  %s174_s24 = scalar_lea.vmem [#allocation2], %s814_s12 }
  0x19   : > { %s180_s23 = sshll.u32 %s179_s20, 4  ;;  %s182_s25 = sshll.u32 %s174_s24, 4  ;;  %s181_s23 = int_to_ptr.hbm [resolvable:$true] %s180_s23  ;;  %s183_s25 = int_to_ptr.vmem [resolvable:$true] %s182_s25 }
  0x1a   : > { %p1358_p11 = pnand %p1006_p7, %p39_p10  ;;  %s171_s28 = scalar_lea.sflag [#allocation3], %s170_s10 }
  0x1b   : > { %s1083_s6 = sshra.s32 %s181_s23, 4  ;;  %s1090_s12 = scalar_lea.hbm %s1655_s0, 256  ;;  %s1084_s6 = int_to_ptr.hbm [resolvable:$true] %s1083_s6 }
  0x1c   : > { %s1085_s7 = scalar_lea.hbm %s1084_s6, 128  ;;  %p1087_p0 = pneg %p1358_p11 }
  0x1d   : > { %p1086_p13 = scmp.ne.s32.totalorder %s1084_s6, %s1085_s7  ;;  %p1091_p7 = scmp.lt.s32.totalorder %s1084_s6, %s1655_s0 }
  0x1e   : > { %p1092_p10 = scmp.lt.s32.totalorder %s1090_s12, %s1085_s7 }
  0x1f   : > { %p1088_p3 = pnand %p1087_p0, %p1086_p13 }
  0x20   : > { %p1093_p2 = por %p1092_p10, %p1091_p7 }
  0x21   : > { %p1089_p12 = pneg %p1088_p3 }
  0x23   : > { %p1094_p8 = pnand %p1093_p2, %p1089_p12 }
  0x25   : > { %1097 = shalt.err (!%p1094_p8)
}
  0x26   : > { %1000 = dma.hbm_to_vmem [thread:$0]  (!%p1358_p11), %s181_s23, 2048, %s183_s25, %s171_s28, %s1246_s30, %s1246_s30, %s1247_s5  }
  0x27   : > { %194 = sbr.rel (%p1322_p9) target bundleno = 364 (0x16c), region = 28  ;;  %s1378_s10 = sand.u32 (!%p1322_p9), 1, %s1235_s16  }
  0x28   : > { %s818_s24 = sshll.u32 (!%p1322_p9), %s1378_s10, 7  ;;  %s197_s6 = scalar_lea.sflag (!%p1322_p9), [#allocation3], %s1378_s10 }
  0x29   : > { %s1382_s7 = scalar_lea.vmem (!%p1322_p9), [#allocation2], %s818_s24 }
  0x2c   : > { %1214 = dma.done.wait (%p1308_p4), %s197_s6, 2048  }
  0x2d   : > { %1216 = vsyncadd (%p1308_p4), %s197_s6, 4294965248 }
  0x2e   : > { %1218 = dma.done.wait (%p44_p1), [#allocation6], 1024  }
  0x2f   : > { %1220 = vsyncadd (%p44_p1), [#allocation6], 4294966272  ;;  %v951_v0 = vld [vmem:[#allocation5 + $0x38] sm:$0xff]  ;;  %v950_v1 = vld [vmem:[#allocation5 + $0x30] sm:$0xff]  ;;  %s820_s21 = sshll.u32 %s1378_s10, 8  ;;  %p1666_p1 = scmp.ne.s32.totalorder %s1299_s19, 0 }
  0x30   : > { %425 = vmatpush.bf16.msra.mxu0 %v951_v0  ;;  %953 = vmatpush.bf16.msra.mxu1 %v951_v0  ;;  %v949_v2 = vld [vmem:[#allocation5 + $0x28] sm:$0xff]  ;;  %v948_v3 = vld [vmem:[#allocation5 + $0x20] sm:$0xff]  ;;  %v947_v4 = vld [vmem:[#allocation5 + $0x18] sm:$0xff]  ;;  %s1413_s26 = scalar_lea.vmem [#allocation7], %s820_s21 }
  0x31   : > { %954 = vmatpush.bf16.msra.mxu2 %v951_v0  ;;  %955 = vmatpush.bf16.msra.mxu3 %v951_v0  ;;  %v946_v5 = vld [vmem:[#allocation5 + $0x10] sm:$0xff]  ;;  %v945_v6 = vld [vmem:[#allocation5 + $0x8] sm:$0xff]  ;;  %v944_v7 = vld [vmem:[#allocation5] sm:$0xff] }
  0x32   : > { %v928_v8 = vld [vmem:[%s1382_s7] sm:$0xff]  ;;  %v929_v12 = vld [vmem:[%s1382_s7 + $0x8] sm:$0xff]  ;;  %v930_v16 = vld [vmem:[%s1382_s7 + $0x10] sm:$0xff] }
  0x33   : > { %v932_v9 = vld [vmem:[%s1382_s7 + $0x20] sm:$0xff]  ;;  %v933_v13 = vld [vmem:[%s1382_s7 + $0x28] sm:$0xff]  ;;  %v934_v17 = vld [vmem:[%s1382_s7 + $0x30] sm:$0xff] }
  0x34   : > { %426 = vmatpush.bf16.msra.mxu0 %v950_v1  ;;  %956 = vmatpush.bf16.msra.mxu1 %v950_v1  ;;  %v936_v10 = vld [vmem:[%s1382_s7 + $0x40] sm:$0xff]  ;;  %v937_v14 = vld [vmem:[%s1382_s7 + $0x48] sm:$0xff]  ;;  %v938_v18 = vld [vmem:[%s1382_s7 + $0x50] sm:$0xff] }
  0x35   : > { %957 = vmatpush.bf16.msra.mxu2 %v950_v1  ;;  %958 = vmatpush.bf16.msra.mxu3 %v950_v1  ;;  %v940_v11 = vld [vmem:[%s1382_s7 + $0x60] sm:$0xff]  ;;  %v941_v15 = vld [vmem:[%s1382_s7 + $0x68] sm:$0xff]  ;;  %v942_v19 = vld [vmem:[%s1382_s7 + $0x70] sm:$0xff] }
  0x36   : > { %v931_v20 = vld [vmem:[%s1382_s7 + $0x18] sm:$0xff] }
  0x37   : > { %v935_v21 = vld [vmem:[%s1382_s7 + $0x38] sm:$0xff] }
  0x38   : > { %427 = vmatpush.bf16.msra.mxu0 %v949_v2  ;;  %959 = vmatpush.bf16.msra.mxu1 %v949_v2  ;;  %v939_v22 = vld [vmem:[%s1382_s7 + $0x58] sm:$0xff] }
  0x39   : > { %960 = vmatpush.bf16.msra.mxu2 %v949_v2  ;;  %961 = vmatpush.bf16.msra.mxu3 %v949_v2  ;;  %v943_v23 = vld [vmem:[%s1382_s7 + $0x78] sm:$0xff] }
  0x3c   : > { %428 = vmatpush.bf16.msra.mxu0 %v948_v3  ;;  %962 = vmatpush.bf16.msra.mxu1 %v948_v3 }
  0x3d   : > { %963 = vmatpush.bf16.msra.mxu2 %v948_v3  ;;  %964 = vmatpush.bf16.msra.mxu3 %v948_v3 }
  0x40   : > { %429 = vmatpush.bf16.msra.mxu0 %v947_v4  ;;  %965 = vmatpush.bf16.msra.mxu1 %v947_v4 }
  0x41   : > { %966 = vmatpush.bf16.msra.mxu2 %v947_v4  ;;  %967 = vmatpush.bf16.msra.mxu3 %v947_v4 }
  0x44   : > { %430 = vmatpush.bf16.msra.mxu0 %v946_v5  ;;  %968 = vmatpush.bf16.msra.mxu1 %v946_v5 }
  0x45   : > { %969 = vmatpush.bf16.msra.mxu2 %v946_v5  ;;  %970 = vmatpush.bf16.msra.mxu3 %v946_v5 }
  0x48   : > { %431 = vmatpush.bf16.msra.mxu0 %v945_v6  ;;  %971 = vmatpush.bf16.msra.mxu1 %v945_v6 }
  0x49   : > { %972 = vmatpush.bf16.msra.mxu2 %v945_v6  ;;  %973 = vmatpush.bf16.msra.mxu3 %v945_v6 }
  0x4c   : > { %432 = vmatpush.bf16.msra.mxu0 %v944_v7  ;;  %974 = vmatpush.bf16.msra.mxu1 %v944_v7 }
  0x4d   : > { %975 = vmatpush.bf16.msra.mxu2 %v944_v7  ;;  %976 = vmatpush.bf16.msra.mxu3 %v944_v7 }
  0x4f   : > { %433 = vmatmul.bf16.vlgmr.msra.gmra.mxu0 %v928_v8  ;;  %453 = vmatmul.bf16.vlgmr.msra.gmra.mxu1 %v932_v9 }
  0x50   : > { %473 = vmatmul.bf16.vlgmr.msra.gmra.mxu2 %v936_v10  ;;  %493 = vmatmul.bf16.vlgmr.msra.gmra.mxu3 %v940_v11 }
  0x5f   : > { %438 = vmatmul.bf16.gmra.mxu0 %v929_v12  ;;  %458 = vmatmul.bf16.gmra.mxu1 %v933_v13 }
  0x60   : > { %478 = vmatmul.bf16.gmra.mxu2 %v937_v14  ;;  %498 = vmatmul.bf16.gmra.mxu3 %v941_v15 }
  0x6f   : > { %443 = vmatmul.bf16.gmra.mxu0 %v930_v16  ;;  %463 = vmatmul.bf16.gmra.mxu1 %v934_v17 }
  0x70   : > { %483 = vmatmul.bf16.gmra.mxu2 %v938_v18  ;;  %503 = vmatmul.bf16.gmra.mxu3 %v942_v19 }
  0x7f   : > { %448 = vmatmul.bf16.gmra.mxu0 %v931_v20  ;;  %468 = vmatmul.bf16.gmra.mxu1 %v935_v21 }
  0x80   : > { %488 = vmatmul.bf16.gmra.mxu2 %v939_v22  ;;  %508 = vmatmul.bf16.gmra.mxu3 %v943_v23 }
  0xcc   : > { %v1409_v24 = vpop.f32.mrf.mxu0  ;;  %v1411_v25 = vpop.f32.mrf.mxu1 }
  0xcd   : > { %514 = vst [vmem:[%s1413_s26] sm:$0xff] %v1409_v24 }
  0xce   : > { %522 = vst [vmem:[%s1413_s26 + $0x40] sm:$0xff] %v1411_v25 }
  0xd3   : > { %v1419_v26 = vpop.f32.mrf.mxu2  ;;  %v1421_v27 = vpop.f32.mrf.mxu3 }
  0xd4   : > { %530 = vst [vmem:[%s1413_s26 + $0x80] sm:$0xff] %v1419_v26  ;;  %v1425_v28 = vpop.f32.mrf.mxu0  ;;  %v1427_v29 = vpop.f32.mrf.mxu1 }
  0xd5   : > { %538 = vst [vmem:[%s1413_s26 + $0xc0] sm:$0xff] %v1421_v27 }
  0xd6   : > { %515 = vst [vmem:[%s1413_s26 + $0x8] sm:$0xff] %v1425_v28 }
  0xd7   : > { %523 = vst [vmem:[%s1413_s26 + $0x48] sm:$0xff] %v1427_v29 }
  0xdb   : > { %v1435_v30 = vpop.f32.mrf.mxu2  ;;  %v1437_v31 = vpop.f32.mrf.mxu3 }
  0xdc   : > { %531 = vst [vmem:[%s1413_s26 + $0x88] sm:$0xff] %v1435_v30  ;;  %v439_v32 = vpop.f32.mrf.mxu0  ;;  %v1441_v33 = vpop.f32.mrf.mxu1 }
  0xdd   : > { %539 = vst [vmem:[%s1413_s26 + $0xc8] sm:$0xff] %v1437_v31 }
  0xde   : > { %516 = vst [vmem:[%s1413_s26 + $0x10] sm:$0xff] %v439_v32 }
  0xdf   : > { %524 = vst [vmem:[%s1413_s26 + $0x50] sm:$0xff] %v1441_v33 }
  0xe3   : > { %v1448_v34 = vpop.f32.mrf.mxu2  ;;  %v1450_v35 = vpop.f32.mrf.mxu3 }
  0xe4   : > { %532 = vst [vmem:[%s1413_s26 + $0x90] sm:$0xff] %v1448_v34  ;;  %v441_v36 = vpop.f32.mrf.mxu0  ;;  %v1454_v37 = vpop.f32.mrf.mxu1 }
  0xe5   : > { %540 = vst [vmem:[%s1413_s26 + $0xd0] sm:$0xff] %v1450_v35 }
  0xe6   : > { %517 = vst [vmem:[%s1413_s26 + $0x18] sm:$0xff] %v441_v36 }
  0xe7   : > { %525 = vst [vmem:[%s1413_s26 + $0x58] sm:$0xff] %v1454_v37 }
  0xeb   : > { %v1461_v38 = vpop.f32.mrf.mxu2  ;;  %v1463_v39 = vpop.f32.mrf.mxu3 }
  0xec   : > { %533 = vst [vmem:[%s1413_s26 + $0x98] sm:$0xff] %v1461_v38  ;;  %v444_v40 = vpop.f32.mrf.mxu0  ;;  %v1467_v41 = vpop.f32.mrf.mxu1 }
  0xed   : > { %541 = vst [vmem:[%s1413_s26 + $0xd8] sm:$0xff] %v1463_v39 }
  0xee   : > { %518 = vst [vmem:[%s1413_s26 + $0x20] sm:$0xff] %v444_v40 }
  0xef   : > { %526 = vst [vmem:[%s1413_s26 + $0x60] sm:$0xff] %v1467_v41 }
  0xf3   : > { %v1474_v42 = vpop.f32.mrf.mxu2  ;;  %v1476_v43 = vpop.f32.mrf.mxu3 }
  0xf4   : > { %534 = vst [vmem:[%s1413_s26 + $0xa0] sm:$0xff] %v1474_v42  ;;  %v1480_v44 = vpop.f32.mrf.mxu0  ;;  %v1482_v45 = vpop.f32.mrf.mxu1 }
  0xf5   : > { %542 = vst [vmem:[%s1413_s26 + $0xe0] sm:$0xff] %v1476_v43 }
  0xf6   : > { %519 = vst [vmem:[%s1413_s26 + $0x28] sm:$0xff] %v1480_v44 }
  0xf7   : > { %527 = vst [vmem:[%s1413_s26 + $0x68] sm:$0xff] %v1482_v45 }
  0xfb   : > { %v1490_v46 = vpop.f32.mrf.mxu2  ;;  %v1492_v47 = vpop.f32.mrf.mxu3 }
  0xfc   : > { %535 = vst [vmem:[%s1413_s26 + $0xa8] sm:$0xff] %v1490_v46  ;;  %v449_v48 = vpop.f32.mrf.mxu0  ;;  %v1496_v49 = vpop.f32.mrf.mxu1 }
  0xfd   : > { %543 = vst [vmem:[%s1413_s26 + $0xe8] sm:$0xff] %v1492_v47 }
  0xfe   : > { %520 = vst [vmem:[%s1413_s26 + $0x30] sm:$0xff] %v449_v48 }
  0xff   : > { %528 = vst [vmem:[%s1413_s26 + $0x70] sm:$0xff] %v1496_v49 }
 0x103   : > { %v1503_v50 = vpop.f32.mrf.mxu2  ;;  %v1505_v51 = vpop.f32.mrf.mxu3 }
 0x104   : > { %536 = vst [vmem:[%s1413_s26 + $0xb0] sm:$0xff] %v1503_v50  ;;  %v451_v52 = vpop.f32.mrf.mxu0  ;;  %v1509_v53 = vpop.f32.mrf.mxu1 }
 0x105   : > { %544 = vst [vmem:[%s1413_s26 + $0xf0] sm:$0xff] %v1505_v51 }
 0x106   : > { %521 = vst [vmem:[%s1413_s26 + $0x38] sm:$0xff] %v451_v52 }
 0x107   : > { %529 = vst [vmem:[%s1413_s26 + $0x78] sm:$0xff] %v1509_v53 }
 0x109   : > { %549 = sbr.rel (%p1666_p1) target bundleno = 273 (0x111), region = 40 }
 0x10b   : > { %v1516_v54 = vpop.f32.mrf.mxu2  ;;  %v1518_v55 = vpop.f32.mrf.mxu3 }
 0x10c   : > { %537 = vst [vmem:[%s1413_s26 + $0xb8] sm:$0xff] %v1516_v54 }
 0x10d   : > { %545 = vst [vmem:[%s1413_s26 + $0xf8] sm:$0xff] %v1518_v55 }
 0x10e   : > { %v1248_v56 = vmov 0.0  }
 0x10f   : > { %550 = vst [vmem:[#allocation8] sm:$0x1] %v1248_v56 }
 0x110   : > { %551 = vst [vmem:[#allocation10] sm:$0x1] %v1248_v56 }
 0x111 PF: > { %v553_v57 = vadd.f32 %v1425_v28, %v1409_v24  ;;  %v593_v58 = vmul.f32 %v1409_v24, %v1409_v24  ;;  %v594_v59 = vmul.f32 %v1425_v28, %v1425_v28  ;;  %v595_v61 = vmul.f32 %v439_v32, %v439_v32  ;;  %s952_s30 = sshll.u32 %s1299_s19, 8  ;;  %s677_s27 = sshll.u32 %s1413_s26, 4  ;;  %s678_s27 = int_to_ptr.vmem [resolvable:$true] %s677_s27 }
 0x112   : > { %s676_s25 = scalar_lea.hbm %s1657_s2, %s952_s30  ;;  %v596_v63 = vmul.f32 %v441_v36, %v441_v36  ;;  %v597_v2 = vmul.f32 %v444_v40, %v444_v40  ;;  %s665_s11 = scalar_lea.sflag [#allocation4], %s1378_s10 }
 0x113   : > { %v554_v60 = vadd.f32 %v553_v57, %v439_v32  ;;  %v625_v0 = vadd.f32 %v594_v59, %v593_v58  ;;  %s679_s28 = sshll.u32 %s676_s25, 4  ;;  %s1133_s24 = scalar_lea.hbm %s1657_s2, 512  ;;  %s680_s28 = int_to_ptr.hbm [resolvable:$true] %s679_s28 }
 0x114   : > { %s1127_s13 = sshra.s32 %s680_s28, 4  ;;  %s1128_s13 = int_to_ptr.hbm [resolvable:$true] %s1127_s13 }
 0x115   : > { %v555_v62 = vadd.f32 %v554_v60, %v441_v36  ;;  %v626_v3 = vadd.f32 %v625_v0, %v595_v61  ;;  %s1129_s12 = scalar_lea.hbm %s1128_s13, 256  ;;  %p1134_p9 = scmp.lt.s32.totalorder %s1128_s13, %s1657_s2 }
 0x116   : > { %p1130_p2 = scmp.ne.s32.totalorder %s1128_s13, %s1129_s12  ;;  %p1135_p12 = scmp.lt.s32.totalorder %s1133_s24, %s1129_s12 }
 0x117   : > { %v556_v1 = vadd.f32 %v555_v62, %v444_v40 }
 0x118   : > { %p1131_p4 = pnand %p1130_p2, %p1348_p5  ;;  %p1136_p11 = por %p1135_p12, %p1134_p9 }
 0x119   : > { %v557_v4 = vadd.f32 %v556_v1, %v1480_v44 }
 0x11a   : > { %p1132_p8 = pneg %p1131_p4 }
 0x11c   : > { %p1137_p13 = pnand %p1136_p11, %p1132_p8 }
 0x11e   : > { %1140 = shalt.err (!%p1137_p13)
}
 0x11f   : > { %s1249_s10 = smov 128   ;;  %s1250_s21 = smov 8   ;;  %v598_v5 = vmul.f32 %v1480_v44, %v1480_v44  ;;  %v627_v6 = vadd.f32 %v626_v3, %v596_v63  ;;  %v558_v7 = vadd.f32 %v557_v4, %v449_v48  ;;  %v599_v8 = vmul.f32 %v449_v48, %v449_v48 }
 0x120   : > { %983 = dma.vmem_to_hbm [thread:$0]  (%p1348_p5), %s678_s27, 4096, %s680_s28, %s665_s11, %s1249_s10, %s1249_s10, %s1250_s21   ;;  %v600_v11 = vmul.f32 %v451_v52, %v451_v52  ;;  %v601_v14 = vmul.f32 %v1411_v25, %v1411_v25  ;;  %v602_v17 = vmul.f32 %v1427_v29, %v1427_v29  ;;  %v603_v20 = vmul.f32 %v1441_v33, %v1441_v33 }
 0x121   : > { %v628_v9 = vadd.f32 %v627_v6, %v597_v2  ;;  %v559_v10 = vadd.f32 %v558_v7, %v451_v52  ;;  %v604_v23 = vmul.f32 %v1454_v37, %v1454_v37  ;;  %v605_v28 = vmul.f32 %v1467_v41, %v1467_v41  ;;  %s1251_s9 = smov [#allocation8]   ;;  %s694_s23 = sshll.u32 %s1658_s3, 4  ;;  %s695_s23 = int_to_ptr.hbm [resolvable:$true] %s694_s23 }
 0x122   : > { %v606_v36 = vmul.f32 %v1482_v45, %v1482_v45  ;;  %v607_v44 = vmul.f32 %v1496_v49, %v1496_v49  ;;  %v608_v52 = vmul.f32 %v1509_v53, %v1509_v53  ;;  %v609_v57 = vmul.f32 %v1419_v26, %v1419_v26  ;;  %s692_s26 = sshll.u32 %s1251_s9, 4  ;;  %s1252_s25 = smov [#allocation10]   ;;  %s693_s26 = int_to_ptr.vmem [resolvable:$true] %s692_s26 }
 0x123   : > { %v629_v12 = vadd.f32 %v628_v9, %v598_v5  ;;  %v560_v13 = vadd.f32 %v559_v10, %v1411_v25  ;;  %v610_v59 = vmul.f32 %v1435_v30, %v1435_v30  ;;  %v611_v61 = vmul.f32 %v1448_v34, %v1448_v34  ;;  %s704_s27 = sshll.u32 %s1252_s25, 4  ;;  %s706_s13 = sshll.u32 %s1659_s4, 4  ;;  %s705_s27 = int_to_ptr.vmem [resolvable:$true] %s704_s27  ;;  %s707_s13 = int_to_ptr.hbm [resolvable:$true] %s706_s13 }
 0x124   : > { %v612_v63 = vmul.f32 %v1461_v38, %v1461_v38  ;;  %v613_v1 = vmul.f32 %v1474_v42, %v1474_v42  ;;  %v614_v3 = vmul.f32 %v1490_v46, %v1490_v46  ;;  %v615_v5 = vmul.f32 %v1503_v50, %v1503_v50  ;;  %p1667_p5 = scmp.eq.s32.totalorder %s1299_s19, 1 }
 0x125   : > { %v630_v15 = vadd.f32 %v629_v12, %v599_v8  ;;  %v561_v16 = vadd.f32 %v560_v13, %v1427_v29  ;;  %v616_v7 = vmul.f32 %v1516_v54, %v1516_v54  ;;  %v617_v9 = vmul.f32 %v1421_v27, %v1421_v27 }
 0x126   : > { %v619_v13 = vmul.f32 %v1450_v35, %v1450_v35  ;;  %p1668_p0 = pmov %p1667_p5 }
 0x127   : > { %v631_v18 = vadd.f32 %v630_v15, %v600_v11  ;;  %v562_v19 = vadd.f32 %v561_v16, %v1441_v33  ;;  %v618_v11 = vmul.f32 %v1437_v31, %v1437_v31  ;;  %v620_v15 = vmul.f32 %v1463_v39, %v1463_v39 }
 0x128   : > { %p1669_p3 = pmov %p1668_p0 }
 0x129   : > { %v632_v21 = vadd.f32 %v631_v18, %v601_v14  ;;  %v563_v22 = vadd.f32 %v562_v19, %v1454_v37  ;;  %v622_v19 = vmul.f32 %v1492_v47, %v1492_v47 }
 0x12b   : > { %v633_v24 = vadd.f32 %v632_v21, %v602_v17  ;;  %v564_v25 = vadd.f32 %v563_v22, %v1467_v41  ;;  %v621_v17 = vmul.f32 %v1476_v43, %v1476_v43  ;;  %v623_v21 = vmul.f32 %v1505_v51, %v1505_v51 }
 0x12d   : > { %v634_v32 = vadd.f32 %v633_v24, %v603_v20  ;;  %v565_v29 = vadd.f32 %v564_v25, %v1482_v45 }
 0x12f   : > { %v635_v40 = vadd.f32 %v634_v32, %v604_v23  ;;  %v566_v33 = vadd.f32 %v565_v29, %v1496_v49  ;;  %v624_v23 = vmul.f32 %v1518_v55, %v1518_v55 }
 0x131   : > { %v636_v48 = vadd.f32 %v635_v40, %v605_v28  ;;  %v567_v37 = vadd.f32 %v566_v33, %v1509_v53 }
 0x133   : > { %v637_v56 = vadd.f32 %v636_v48, %v606_v36  ;;  %v568_v41 = vadd.f32 %v567_v37, %v1419_v26 }
 0x135   : > { %v638_v58 = vadd.f32 %v637_v56, %v607_v44  ;;  %v569_v45 = vadd.f32 %v568_v41, %v1435_v30  ;;  %v552_v44 = vld [vmem:[#allocation8] sm:$0x1]  ;;  %v592_v56 = vld [vmem:[#allocation10] sm:$0x1] }
 0x137   : > { %v639_v60 = vadd.f32 %v638_v58, %v608_v52  ;;  %v570_v49 = vadd.f32 %v569_v45, %v1448_v34 }
 0x139   : > { %v640_v62 = vadd.f32 %v639_v60, %v609_v57  ;;  %v571_v53 = vadd.f32 %v570_v49, %v1461_v38 }
 0x13b   : > { %v641_v0 = vadd.f32 %v640_v62, %v610_v59  ;;  %v572_v26 = vadd.f32 %v571_v53, %v1474_v42 }
 0x13d   : > { %v642_v2 = vadd.f32 %v641_v0, %v611_v61  ;;  %v573_v30 = vadd.f32 %v572_v26, %v1490_v46 }
 0x13f   : > { %v643_v4 = vadd.f32 %v642_v2, %v612_v63  ;;  %v574_v34 = vadd.f32 %v573_v30, %v1503_v50 }
 0x141   : > { %v644_v6 = vadd.f32 %v643_v4, %v613_v1  ;;  %v575_v38 = vadd.f32 %v574_v34, %v1516_v54 }
 0x143   : > { %v645_v8 = vadd.f32 %v644_v6, %v614_v3  ;;  %v576_v42 = vadd.f32 %v575_v38, %v1421_v27 }
 0x145   : > { %v646_v10 = vadd.f32 %v645_v8, %v615_v5  ;;  %v577_v46 = vadd.f32 %v576_v42, %v1437_v31 }
 0x147   : > { %v647_v12 = vadd.f32 %v646_v10, %v616_v7  ;;  %v578_v50 = vadd.f32 %v577_v46, %v1450_v35 }
 0x149   : > { %v648_v14 = vadd.f32 %v647_v12, %v617_v9  ;;  %v579_v54 = vadd.f32 %v578_v50, %v1463_v39 }
 0x14b   : > { %v649_v16 = vadd.f32 %v648_v14, %v618_v11  ;;  %v580_v27 = vadd.f32 %v579_v54, %v1476_v43 }
 0x14d   : > { %v650_v18 = vadd.f32 %v649_v16, %v619_v13  ;;  %v581_v31 = vadd.f32 %v580_v27, %v1492_v47 }
 0x14f   : > { %v651_v20 = vadd.f32 %v650_v18, %v620_v15  ;;  %v582_v35 = vadd.f32 %v581_v31, %v1505_v51 }
 0x151   : > { %v652_v22 = vadd.f32 %v651_v20, %v621_v17  ;;  %v583_v39 = vadd.f32 %v582_v35, %v1518_v55 }
 0x153   : > { %v653_v24 = vadd.f32 %v652_v22, %v622_v19  ;;  %v584_v43 = vrot.slane %v583_v39, 4 }
 0x155   : > { %v654_v25 = vadd.f32 %v653_v24, %v623_v21  ;;  %v585_v28 = vadd.f32 %v584_v43, %v583_v39 }
 0x157   : > { %v655_v32 = vadd.f32 %v654_v25, %v624_v23  ;;  %v586_v29 = vrot.slane %v585_v28, 2 }
 0x159   : > { %v656_v36 = vrot.slane %v655_v32, 4  ;;  %v587_v47 = vadd.f32 %v586_v29, %v585_v28 }
 0x15b   : > { %v657_v40 = vadd.f32 %v656_v36, %v655_v32  ;;  %v588_v33 = vrot.slane %v587_v47, 1 }
 0x15d   : > { %v658_v48 = vrot.slane %v657_v40, 2  ;;  %v589_v51 = vadd.f32 %v588_v33, %v587_v47 }
 0x15f   : > { %v659_v55 = vadd.f32 %v658_v48, %v657_v40  ;;  %v590_v37 = vadd.f32 %v589_v51, %v552_v44 }
 0x161   : > { %v660_v52 = vrot.slane %v659_v55, 1  ;;  %591 = vst [vmem:[#allocation8] sm:$0x1] %v590_v37 }
 0x162   : > { %985 = dma.vmem_to_hbm [thread:$0]  (%p1667_p5), %s693_s26, 16, %s695_s23, [#allocation9]  }
 0x163   : > { %v661_v41 = vadd.f32 %v660_v52, %v659_v55 }
 0x165   : > { %v662_v57 = vadd.f32 %v661_v41, %v592_v56 }
 0x167   : > { %663 = vst [vmem:[#allocation10] sm:$0x1] %v662_v57 }
 0x168   : > { %987 = dma.vmem_to_hbm [thread:$0]  (%p1668_p0), %s705_s27, 16, %s707_s13, [#allocation9]  }
 0x169   : > { %1222 = dma.done.wait (%p1669_p3), [#allocation9], 32   ;;  %p1670_p7 = pmov %p1668_p0 }
 0x16b   : > { %1224 = vsyncadd (%p1670_p7), [#allocation9], 4294967264 }
 0x16c PF: > { %s728_s12 = sand.u32 1, %s1231_s15   ;;  %p1671_p10 = scmp.ge.s32.totalorder %s1243_s18, 2 }
 0x16d   : > { %s729_s14 = scalar_lea.sflag [#allocation4], %s728_s12 }
 0x16e   : > { %p1002_p1 = pnand %p1671_p10, %p1313_p6 }
 0x170   : > { %p1003_p2 = pneg %p1002_p1 }
 0x172   : > { %1226 = dma.done.wait (%p1003_p2), %s729_s14, 4096  }
 0x173   : > { %1228 = vsyncadd (%p1003_p2), %s729_s14, 4294963200  ;;  %p20_p4 = scmp.ge.s32.totalorder %s1332_s29, 4   ;;  %s1672_s15 = smov %s1235_s16 }
 0x174   : > { %s1673_s16 = smov %s1239_s17  ;;  %s1674_s17 = smov %s1344_s8 }
 0x175   : > { %s1675_s18 = smov %s1332_s29  ;;  %22 = sbr.rel (!%p20_p4) target bundleno = 7 (0x7), region = 97 }
 0x17a   :  { %735 = vsyncpa [#allocation3], 1 }
 0x17b   :  { %737 = vsyncpa [#allocation3 + $0x1], 1 }
 0x17c   :  { %738 = vsyncpa [#allocation6], 1 }
 0x17d   :  { %739 = vsyncpa [#allocation4], 1 }
 0x17e   :  { %741 = vsyncpa [#allocation4 + $0x1], 1 }
 0x17f   :  { %742 = vsyncpa [#allocation9], 1 }

</bundles_post_ra>
